<compile_context>
chip_gen: v7x
topology: tpu7x:2x2x1
jax: 0.10.0
libtpu: 0.0.40
codegen_flags: <defaults>
</compile_context>

<pallas_src>
import math

import jax
import jax.numpy as jnp
from jax.experimental import pallas as pl
from jax.experimental.pallas import tpu as pltpu


# ----------------------------------------------------------------------------
# Kernels
# ----------------------------------------------------------------------------
def _make_split_kernel(sections: int, cols: int):
    """Merged kernel: one full-width input row tile -> `sections` outputs."""
    def kernel(x_ref, *o_refs):
        for s in range(sections):
            # Static slice; 128-aligned whenever cols % 128 == 0 (lane-dense).
            o_refs[s][...] = x_ref[:, s * cols:(s + 1) * cols]
    return kernel


def _copy_kernel(x_ref, o_ref):
    # Straight VMEM tile copy; BlockSpecs do all of the work.
    o_ref[...] = x_ref[...]


# ----------------------------------------------------------------------------
# Sizing helpers
# ----------------------------------------------------------------------------
def _vmem_capacity_bytes() -> int:
    """Physical VMEM capacity of the current chip (fallback: 128 MiB)."""
    try:
        info = pltpu.get_tpu_info()
        cap = int(getattr(info, "vmem_capacity_bytes", 0))
        if cap > 0:
            return cap
    except Exception:
        pass
    return 128 << 20


def _sublane_align(dtype) -> int:
    """Row-tile alignment: 8 rows for 32-bit, 16 for 16-bit, 32 for 8-bit
    (sub-32-bit dtypes pack multiple rows per sublane)."""
    itemsize = jnp.dtype(dtype).itemsize
    return max(8, 32 // max(itemsize, 1))


def _pick_row_tile(rows: int, row_bytes: int, budget_bytes: int, align: int) -> int:
    """Largest row tile (multiple of `align`, or the full extent) whose block
    stays under budget_bytes. The grid uses pl.cdiv, so the tile does NOT have
    to divide `rows` (ragged last block is fine for a copy)."""
    max_rows = max(align, (budget_bytes // max(row_bytes, 1)) // align * align)
    if rows <= max_rows:
        tile = rows
        # Prefer >=2 grid steps so the "parallel" row axis can shard across
        # v7x's two TensorCores; no-op on v5e/v6e (1 TC), negligible overhead.
        if rows >= 2 * align:
            tile = ((rows + 1) // 2 + align - 1) // align * align
        return tile
    return max_rows


# ----------------------------------------------------------------------------
# dsplit paths
# ----------------------------------------------------------------------------
def _dsplit_merged(x2, sections, cols, lead, itemsize, align, tile_budget,
                   vmem_limit):
    """Single pallas_call: full-width row tile in, one output per section."""
    W = sections * cols
    tile_rows = _pick_row_tile(lead, W * itemsize, tile_budget, align)
    grid_rows = pl.cdiv(lead, tile_rows)

    return pl.pallas_call(
        _make_split_kernel(sections, cols),
        out_shape=tuple(
            jax.ShapeDtypeStruct((lead, cols), x2.dtype) for _ in range(sections)
        ),
        grid_spec=pltpu.PrefetchScalarGridSpec(
            num_scalar_prefetch=0,
            grid=(grid_rows,),
            in_specs=[pl.BlockSpec((tile_rows, W), lambda i: (i, 0))],
            out_specs=tuple(
                pl.BlockSpec((tile_rows, cols), lambda i: (i, 0))
                for _ in range(sections)
            ),
        ),
        compiler_params=pltpu.CompilerParams(
            dimension_semantics=("parallel",),
            vmem_limit_bytes=int(vmem_limit),
        ),
    )(x2)


def _dsplit_wide(x2, sections, cols, lead, itemsize, align, tile_budget,
                 vmem_limit):
    """Fallback for very wide sections (full-width tile > budget).
    Requires cols % 128 == 0: per-section copies tiled over rows AND columns
    with lane-dense (128-multiple) column blocks."""
    # Largest 128-multiple column tile that divides cols and fits the budget.
    max_tc = max(128, (tile_budget // (align * itemsize)) // 128 * 128)
    tc = 128
    for cand in range(min(cols, max_tc), 127, -128):
        if cols % cand == 0:
            tc = cand
            break
    nblk = cols // tc
    tile_rows = _pick_row_tile(lead, tc * itemsize, tile_budget, align)
    grid = (pl.cdiv(lead, tile_rows), nblk)

    outs = []
    for s in range(sections):
        out = pl.pallas_call(
            _copy_kernel,
            out_shape=jax.ShapeDtypeStruct((lead, cols), x2.dtype),
            grid_spec=pltpu.PrefetchScalarGridSpec(
                num_scalar_prefetch=0,
                grid=grid,
                in_specs=[
                    pl.BlockSpec(
                        (tile_rows, tc),
                        lambda i, j, s=s, nblk=nblk: (i, s * nblk + j),
                    )
                ],
                out_specs=pl.BlockSpec((tile_rows, tc), lambda i, j: (i, j)),
            ),
            compiler_params=pltpu.CompilerParams(
                dimension_semantics=("parallel", "parallel"),
                vmem_limit_bytes=int(vmem_limit),
            ),
        )(x2)
        outs.append(out)
    return outs


def dsplit(x, sections: int):
    """Pallas equivalent of torch.dsplit(x, sections=sections).
    Returns a tuple of `sections` arrays (copies of each depth chunk)."""
    assert x.ndim >= 3, "dsplit requires at least 3 dims"
    D = x.shape[2]
    assert D % sections == 0, "dsplit requires the depth dim to divide evenly"
    chunk = D // sections

    lead = math.prod(x.shape[:2])
    trail = math.prod(x.shape[3:]) if x.ndim > 3 else 1
    cols = chunk * trail                       # one section, flattened width
    W = sections * cols                        # full flattened width
    itemsize = jnp.dtype(x.dtype).itemsize
    align = _sublane_align(x.dtype)
    out_shape_nd = x.shape[:2] + (chunk,) + x.shape[3:]

    # Generation-aware VMEM sizing (v7x: 64 MiB physical -> 32 MiB limit;
    # v5e/v6e: 128 MiB physical -> 64 MiB limit). Per-step footprint of the
    # merged kernel is ~4x the full-width tile (in + outs, double-buffered),
    # so a budget of limit // 6 keeps comfortable headroom.
    cap = _vmem_capacity_bytes()
    vmem_limit = min(max(cap // 2, 16 << 20), 64 << 20)
    tile_budget = vmem_limit // 6

    # Free (no-transpose) 2-D view: section s is the contiguous column block
    # [s*cols, (s+1)*cols). Block shapes stay legal for any cols (last block
    # dim equals the full array dim); lane-dense whenever cols % 128 == 0.
    x2 = x.reshape(lead, W)

    min_tile_bytes = min(lead, align) * W * itemsize
    if min_tile_bytes > tile_budget and cols % 128 == 0 and lead > align:
        outs2 = _dsplit_wide(x2, sections, cols, lead, itemsize, align,
                             tile_budget, vmem_limit)
    else:
        if min_tile_bytes > tile_budget:
            # Pathological case: extremely wide sections whose width is not a
            # multiple of 128. Raise the scoped limit rather than emitting an
            # illegal sub-128 column block.
            # TODO(synk): ragged column tiling for non-128-multiple sections.
            vmem_limit = min(max(6 * min_tile_bytes, vmem_limit),
                             max(cap - (4 << 20), vmem_limit))
            tile_budget = min_tile_bytes
        outs2 = _dsplit_merged(x2, sections, cols, lead, itemsize, align,
                               tile_budget, vmem_limit)

    return tuple(o.reshape(out_shape_nd) for o in outs2)


if __name__ == "__main__":
    key = jax.random.PRNGKey(0)
    # (B, C, D, W) int input, consistent with dsplit_model_int
    x = jax.random.randint(key, (2, 4, 16, 16), minval=-100, maxval=100,
                           dtype=jnp.int32)
    split_size = 2

    dsplit_fn = jax.jit(dsplit, static_argnums=1)
    outs = dsplit_fn(x, split_size)
    outs = jax.block_until_ready(outs)

    # correctness check against plain JAX reference (jnp.dsplit == torch.dsplit)
    refs = jnp.dsplit(x, split_size)
    assert len(outs) == split_size
    for o, r in zip(outs, refs):
        assert o.shape == r.shape and o.dtype == r.dtype
        assert bool(jnp.all(o == r))

    print("KERNEL_OK")
</pallas_src>

<mosaic_0001>
module attributes {stable_mosaic.version = 11 : i64} {
  func.func @kernel(%arg0: i32, %arg1: memref<8x256xi32, #tpu.memory_space<vmem>>, %arg2: memref<8x128xi32, #tpu.memory_space<vmem>>, %arg3: memref<8x128xi32, #tpu.memory_space<vmem>>) attributes {dimension_semantics = [#tpu.dimension_semantics<parallel>], iteration_bounds = array<i64: 1>, scalar_prefetch = 0 : i64, scratch_operands = 0 : i64, tpu.core_type = #tpu.core_type<tc>, window_params = [{transform_indices = @transform_0, window_bounds = array<i64: 8, 256>}, {transform_indices = @transform_1, window_bounds = array<i64: 8, 128>}, {transform_indices = @transform_2, window_bounds = array<i64: 8, 128>}]} {
    %c0 = arith.constant 0 : index
    %c0_0 = arith.constant 0 : index
    %0 = vector.load %arg1[%c0, %c0_0] : memref<8x256xi32, #tpu.memory_space<vmem>>, vector<8x128xi32>
    %c0_1 = arith.constant 0 : index
    %c0_2 = arith.constant 0 : index
    %1 = vector.load %arg2[%c0_1, %c0_2] : memref<8x128xi32, #tpu.memory_space<vmem>>, vector<8x128xi32>
    tpu.vector_store %arg2[%c0_1, %c0_2], %0 {strides = array<i32>} : memref<8x128xi32, #tpu.memory_space<vmem>>, vector<8x128xi32>,
    %c0_3 = arith.constant 0 : index
    %c128 = arith.constant 128 : index
    %2 = vector.load %arg1[%c0_3, %c128] : memref<8x256xi32, #tpu.memory_space<vmem>>, vector<8x128xi32>
    %c0_4 = arith.constant 0 : index
    %c0_5 = arith.constant 0 : index
    %3 = vector.load %arg3[%c0_4, %c0_5] : memref<8x128xi32, #tpu.memory_space<vmem>>, vector<8x128xi32>
    tpu.vector_store %arg3[%c0_4, %c0_5], %2 {strides = array<i32>} : memref<8x128xi32, #tpu.memory_space<vmem>>, vector<8x128xi32>,
    return
  }
  func.func @transform_0(%arg0: i32) -> (i32, i32) {
    %c0_i32 = arith.constant 0 : i32
    %c0_i32_0 = arith.constant 0 : i32
    return %arg0, %c0_i32 : i32, i32
  }
  func.func @transform_1(%arg0: i32) -> (i32, i32) {
    %c0_i32 = arith.constant 0 : i32
    %c0_i32_0 = arith.constant 0 : i32
    return %arg0, %c0_i32 : i32, i32
  }
  func.func @transform_2(%arg0: i32) -> (i32, i32) {
    %c0_i32 = arith.constant 0 : i32
    %c0_i32_0 = arith.constant 0 : i32
    return %arg0, %c0_i32 : i32, i32
  }
}

</mosaic_0001>

<bundles_post_ra>
// kernel: dsplit.1
= control target key start
LH: loop header
LB: loop body
LE: loop exit
PB: predicated region body
PF: predicated region fallthrough
CT: control target
= control target key end

     0   :  { %8 = vsyncpa [#allocation3], 0  ;;  %s186_s0 = inlined_call_operand.hbm [shape: s32[8,256], index: 0, kind: input, shape index: {}]   ;;  %s187_s1 = inlined_call_operand.hbm [shape: s32[8,128], index: 1, kind: output, shape index: {0}]   ;;  %s188_s2 = inlined_call_operand.hbm [shape: s32[8,128], index: 2, kind: output, shape index: {1}]  }
   0x1   :  { %9 = vsyncpa [#allocation4], 0 }
   0x2   :  { %10 = vsyncpa [#allocation7], 0  ;;  %s132_s9 = smov [#allocation2]   ;;  %s60_s13 = scalar_lea.hbm %s186_s0, 256 }
   0x3   :  { %s17_s10 = sshll.u32 %s132_s9, 4  ;;  %p61_p0 = scmp.ne.s32.totalorder %s186_s0, %s60_s13  ;;  %s18_s10 = int_to_ptr.vmem [resolvable:$true] %s17_s10 }
   0x4   :  { %p64_p1 = scmp.lt.u32.totalorder %s60_s13, %s186_s0 }
   0x6   :  { %p66_p2 = pnand %p64_p1, %p61_p0 }
   0x8   :  { %69 = shalt.err (!%p66_p2)
}
   0x9   :  { %s70_s18 = scalar_lea.vmem %s18_s10, 256  ;;  %p75_p4 = scmp.lt.s32.totalorder %s18_s10, %s18_s10 }
   0xa   :  { %p71_p3 = scmp.ne.s32.totalorder %s18_s10, %s70_s18  ;;  %p76_p5 = scmp.lt.s32.totalorder %s70_s18, %s70_s18 }
   0xc   :  { %p77_p6 = por %p76_p5, %p75_p4 }
   0xe   :  { %p78_p7 = pnand %p77_p6, %p71_p3 }
  0x10   :  { %81 = shalt.err (!%p78_p7)
}
  0x11   :  { %20 = dma.hbm_to_vmem [thread:$0]  %s186_s0, 256, %s18_s10, [#allocation3]  }
  0x12   :  { %126 = dma.done.wait [#allocation3], 256  }
  0x13   :  { %127 = vsyncadd [#allocation3], 4294967040  ;;  %s133_s21 = smov [#allocation5]   ;;  %s134_s23 = smov [#allocation6]   ;;  %v24_v0 = vld [vmem:[#allocation2] sm:$0xff]  ;;  %v26_v1 = vld [vmem:[#allocation2 + $0x8] sm:$0xff] }
  0x14   :  { %s34_s22 = sshll.u32 %s133_s21, 4  ;;  %s44_s24 = sshll.u32 %s134_s23, 4  ;;  %25 = vst [vmem:[#allocation5] sm:$0xff] %v24_v0  ;;  %27 = vst [vmem:[#allocation6] sm:$0xff] %v26_v1  ;;  %s35_s22 = int_to_ptr.vmem [resolvable:$true] %s34_s22  ;;  %s45_s24 = int_to_ptr.vmem [resolvable:$true] %s44_s24 }
  0x15   :  { %s82_s25 = scalar_lea.vmem %s35_s22, 128  ;;  %p87_p9 = scmp.lt.s32.totalorder %s35_s22, %s35_s22 }
  0x16   :  { %p83_p8 = scmp.ne.s32.totalorder %s35_s22, %s82_s25  ;;  %p88_p10 = scmp.lt.s32.totalorder %s82_s25, %s82_s25 }
  0x18   :  { %p89_p11 = por %p88_p10, %p87_p9 }
  0x1a   :  { %p90_p12 = pnand %p89_p11, %p83_p8 }
  0x1c   :  { %93 = shalt.err (!%p90_p12)
}
  0x1d   :  { %s94_s27 = scalar_lea.hbm %s187_s1, 128 }
  0x1e   :  { %p95_p13 = scmp.ne.s32.totalorder %s187_s1, %s94_s27  ;;  %p98_p0 = scmp.lt.u32.totalorder %s94_s27, %s187_s1 }
  0x20   :  { %p100_p1 = pnand %p98_p0, %p95_p13 }
  0x22   :  { %103 = shalt.err (!%p100_p1)
}
  0x23   :  { %37 = dma.vmem_to_hbm [thread:$0]  %s35_s22, 128, %s187_s1, [#allocation4]  }
  0x24   :  { %s104_s6 = scalar_lea.vmem %s45_s24, 128  ;;  %p109_p3 = scmp.lt.s32.totalorder %s45_s24, %s45_s24 }
  0x25   :  { %p105_p2 = scmp.ne.s32.totalorder %s45_s24, %s104_s6  ;;  %p110_p4 = scmp.lt.s32.totalorder %s104_s6, %s104_s6 }
  0x27   :  { %p111_p5 = por %p110_p4, %p109_p3 }
  0x29   :  { %p112_p6 = pnand %p111_p5, %p105_p2 }
  0x2b   :  { %115 = shalt.err (!%p112_p6)
}
  0x2c   :  { %s116_s9 = scalar_lea.hbm %s188_s2, 128 }
  0x2d   :  { %p117_p7 = scmp.ne.s32.totalorder %s188_s2, %s116_s9  ;;  %p120_p8 = scmp.lt.u32.totalorder %s116_s9, %s188_s2 }
  0x2f   :  { %p122_p9 = pnand %p120_p8, %p117_p7 }
  0x31   :  { %125 = shalt.err (!%p122_p9)
}
  0x32   :  { %47 = dma.vmem_to_hbm [thread:$0]  %s45_s24, 128, %s188_s2, [#allocation7]  }
  0x33   :  { %128 = dma.done.wait [#allocation4], 128  }
  0x34   :  { %129 = vsyncadd [#allocation4], 4294967168 }
  0x35   :  { %130 = dma.done.wait [#allocation7], 128  }
  0x36   :  { %131 = vsyncadd [#allocation7], 4294967168 }
  0x37   :  { %54 = vsyncpa [#allocation3], 1 }
  0x38   :  { %55 = vsyncpa [#allocation4], 1 }
  0x39   :  { %56 = vsyncpa [#allocation7], 1 }

</bundles_post_ra>
